<compile_context>
chip_gen: v5e
topology: v5e:2x2
jax: 0.10.0
libtpu: 0.0.40
codegen_flags: <defaults>
</compile_context>

<pallas_src>
import numpy as np
import jax
import jax.numpy as jnp
from jax.experimental import pallas as pl
from jax.experimental.pallas import tpu as pltpu

DIM = 32            # self.dim
N_DIAG = 64         # len(diag_voc.idx2word)
N_MED = 48          # len(med_voc.idx2word)

VCAT = 2 * N_DIAG + N_MED     # 176 combined vocab: [past-diag | cur-diag | past-med]
DCAT = 3 * DIM                # 96  = concat(y1, y2, y3) width

K_PAD = 256                   # lane-padded combined-vocab width (MXU pads K to 256 anyway)
N_PAD = 128                   # lane-padded hidden / output width
BIAS_ROW = VCAT               # act column that is constant 1.0 (bias row of fused table)
BIAS_LANE = N_PAD - 1         # hidden lane that carries constant 1.0 through the head
W_SLAB_ROWS = K_PAD + 2 * N_PAD   # 512 rows: [fused_table | wc1_pad | wc2_pad]

TB = 128                      # batch tile (M) per grid step


# ----------------------------------------------------------------------------- kernel
def _agg_batch_kernel(act_ref, w_ref, out_ref):
    # act_ref : (TB, K_PAD)  f32 — per-patient multi-hot pooling rows (+ bias lane)
    # w_ref   : (512, N_PAD) f32 — [fused_table(256) | cls1_pad(128) | cls2_pad(128)]
    # out_ref : (TB, N_PAD)  f32 — sigmoid(logits) (cols >= N_MED are padding)
    ft = w_ref[0:K_PAD, :]                         # tables pre-fused with w1/w1/w2 (+ biases)
    wc1 = w_ref[K_PAD:K_PAD + N_PAD, :]            # cls layer 1 (zero/bias padded)
    wc2 = w_ref[K_PAD + N_PAD:K_PAD + 2 * N_PAD, :]

    # relu(dense1(xd) | dense1(xc) | dense2(xm)) — one MXU pass over the fused table
    h0 = jnp.maximum(jnp.dot(act_ref[...], ft, preferred_element_type=jnp.float32), 0.0)
    # cls layer 1 + ReLU (bias carried through the constant-1 lane)
    h1 = jnp.maximum(jnp.dot(h0, wc1, preferred_element_type=jnp.float32), 0.0)
    # cls layer 2 + sigmoid
    logits = jnp.dot(h1, wc2, preferred_element_type=jnp.float32)
    out_ref[...] = jax.nn.sigmoid(logits)


# ----------------------------------------------------------------------------- params
def init_params(key, dim=DIM, n_diag=N_DIAG, n_med=N_MED):
    ks = jax.random.split(key, 10)
    s = 0.1
    return {
        "diag_emb": jax.random.normal(ks[0], (n_diag, dim), jnp.float32) * s,
        "med_emb":  jax.random.normal(ks[1], (n_med, dim),  jnp.float32) * s,
        # dense1 / dense2: y = x @ W + b
        "w1": jax.random.normal(ks[2], (dim, dim), jnp.float32) * s,
        "b1": jax.random.normal(ks[3], (1, dim),   jnp.float32) * s,
        "w2": jax.random.normal(ks[4], (dim, dim), jnp.float32) * s,
        "b2": jax.random.normal(ks[5], (1, dim),   jnp.float32) * s,
        # cls: Linear(3*dim, 2*dim) + ReLU + Linear(2*dim, n_med)
        "wc1": jax.random.normal(ks[6], (3 * dim, 2 * dim), jnp.float32) * s,
        "bc1": jax.random.normal(ks[7], (1, 2 * dim),       jnp.float32) * s,
        "wc2": jax.random.normal(ks[8], (2 * dim, n_med),   jnp.float32) * s,
        "bc2": jax.random.normal(ks[9], (1, n_med),         jnp.float32) * s,
    }


def prepare_params(params):
    """One-time packing of all weights AND biases into a single (512, 128) slab."""
    dim = DIM
    dproj = params["diag_emb"] @ params["w1"]          # (64, 32)  table pre-fused with dense1
    mproj = params["med_emb"] @ params["w2"]           # (48, 32)  table pre-fused with dense2

    ft = jnp.zeros((K_PAD, N_PAD), jnp.float32)
    ft = ft.at[0:N_DIAG, 0:dim].set(dproj)                        # past-diag slot -> y1 cols
    ft = ft.at[N_DIAG:2 * N_DIAG, dim:2 * dim].set(dproj)         # cur-diag  slot -> y2 cols
    ft = ft.at[2 * N_DIAG:VCAT, 2 * dim:3 * dim].set(mproj)       # past-med  slot -> y3 cols
    b_cat = jnp.concatenate([params["b1"], params["b1"], params["b2"]], axis=1)   # (1, 96)
    ft = ft.at[BIAS_ROW, 0:DCAT].set(b_cat[0])                    # bias row (act bias col = 1)
    ft = ft.at[BIAS_ROW, BIAS_LANE].set(1.0)                      # propagate constant-1 lane

    wc1 = jnp.zeros((N_PAD, N_PAD), jnp.float32)
    wc1 = wc1.at[0:DCAT, 0:2 * dim].set(params["wc1"])
    wc1 = wc1.at[BIAS_LANE, 0:2 * dim].set(params["bc1"][0])
    wc1 = wc1.at[BIAS_LANE, BIAS_LANE].set(1.0)                   # keep constant-1 lane alive

    wc2 = jnp.zeros((N_PAD, N_PAD), jnp.float32)
    wc2 = wc2.at[0:2 * dim, 0:N_MED].set(params["wc2"])
    wc2 = wc2.at[BIAS_LANE, 0:N_MED].set(params["bc2"][0])

    w_slab = jnp.concatenate([ft, wc1, wc2], axis=0)              # (512, 128), 256 KB
    return {"w_slab": w_slab}


# ----------------------------------------------------------------------------- packing
def pack_histories(histories):
    """Host-side: fold ragged visit histories into lane-dense multi-hot pooling rows."""
    B = len(histories)
    act = np.zeros((B, K_PAD), np.float32)
    for b, history in enumerate(histories):
        n = len(history)
        assert n >= 2, "Agg.forward requires at least 2 visits (stack of empty otherwise)"
        n_past = float(n - 1)
        for t in range(n - 1):
            d = np.asarray(history[t][0]).reshape(-1).astype(np.int64)
            m = np.asarray(history[t][2]).reshape(-1).astype(np.int64)
            assert d.size > 0 and m.size > 0, "empty past visit is undefined in the reference"
            np.add.at(act[b], d, np.float32(1.0 / (n_past * d.size)))                 # past-diag
            np.add.at(act[b], 2 * N_DIAG + m, np.float32(1.0 / (n_past * m.size)))    # past-med
        c = np.asarray(history[n - 1][0]).reshape(-1).astype(np.int64)
        assert c.size > 0, "empty current-visit diag list is undefined in the reference"
        np.add.at(act[b], N_DIAG + c, np.float32(1.0 / c.size))                       # cur-diag
        act[b, BIAS_ROW] = 1.0                                                        # bias lane
    return act


# ----------------------------------------------------------------------------- forward
@jax.jit
def _agg_pallas(w_slab, act):
    b_pad = act.shape[0]
    grid = (b_pad // TB,)
    return pl.pallas_call(
        _agg_batch_kernel,
        out_shape=jax.ShapeDtypeStruct((b_pad, N_PAD), jnp.float32),
        grid_spec=pltpu.PrefetchScalarGridSpec(
            num_scalar_prefetch=0,
            grid=grid,
            in_specs=[
                pl.BlockSpec((TB, K_PAD), lambda b: (b, 0)),          # batch tile of act
                pl.BlockSpec((W_SLAB_ROWS, N_PAD), lambda b: (0, 0)),  # weights stay resident
            ],
            out_specs=pl.BlockSpec((TB, N_PAD), lambda b: (b, 0)),
        ),
        compiler_params=pltpu.CompilerParams(
            dimension_semantics=("parallel",)),   # v7x: split batch tiles across the 2 TCs
    )(act, w_slab)


def agg_forward_batch(histories, packed):
    """Batched JAX/Pallas equivalent of [Agg.forward(h) for h in histories] -> (B, N_MED)."""
    act_np = pack_histories(histories)
    B = act_np.shape[0]
    b_pad = ((B + TB - 1) // TB) * TB
    if b_pad != B:
        act_np = np.concatenate(
            [act_np, np.zeros((b_pad - B, K_PAD), np.float32)], axis=0)
    out = _agg_pallas(packed["w_slab"], jnp.asarray(act_np))
    return out[:B, :N_MED]


def agg_forward(history, packed):
    """Single-patient wrapper matching Agg.forward(history) -> (1, N_MED)."""
    return agg_forward_batch([history], packed)


# ----------------------------------------------------------------------------- reference
def agg_reference(params, history):
    """Pure-JAX reference matching the torch module (for sanity checking)."""
    T = len(history)
    relu = lambda x: jnp.maximum(x, 0.0)
    pd = [jnp.mean(params["diag_emb"][jnp.asarray(history[t][0])], axis=0) for t in range(T - 1)]
    pm = [jnp.mean(params["med_emb"][jnp.asarray(history[t][2])], axis=0) for t in range(T - 1)]
    diag_e = jnp.stack(pd).mean(axis=0)
    med_e = jnp.stack(pm).mean(axis=0)
    cur_e = jnp.mean(params["diag_emb"][jnp.asarray(history[T - 1][0])], axis=0)
    y1 = relu(diag_e @ params["w1"] + params["b1"][0])
    y2 = relu(cur_e @ params["w1"] + params["b1"][0])
    y3 = relu(med_e @ params["w2"] + params["b2"][0])
    pat = jnp.concatenate([y1, y2, y3])
    h = relu(pat @ params["wc1"] + params["bc1"][0])
    logits = h @ params["wc2"] + params["bc2"][0]
    return jax.nn.sigmoid(logits)[None, :]


# ----------------------------------------------------------------------------- main
if __name__ == "__main__":
    key = jax.random.PRNGKey(0)
    pkey, hkey = jax.random.split(key)
    params = init_params(pkey)
    packed = prepare_params(params)

    # Deterministic synthetic histories; visit = (diag_codes, _unused_, med_codes)
    ks = jax.random.split(hkey, 16)

    def visit(kd, km, nd, nm):
        return (jax.random.randint(kd, (nd,), 0, N_DIAG), None,
                jax.random.randint(km, (nm,), 0, N_MED))

    histories = [
        [visit(ks[0], ks[1], 5, 4), visit(ks[2], ks[3], 3, 6), visit(ks[4], ks[5], 4, 2)],
        [visit(ks[6], ks[7], 7, 3), visit(ks[8], ks[9], 2, 5)],
        [visit(ks[10], ks[11], 6, 6), visit(ks[12], ks[13], 4, 4), visit(ks[14], ks[15], 9, 1)],
    ]

    out = agg_forward_batch(histories, packed)
    out = jax.block_until_ready(out)

    assert out.shape == (len(histories), N_MED) and out.dtype == jnp.float32
    assert bool(jnp.all((out >= 0.0) & (out <= 1.0)))

    for b, h in enumerate(histories):
        ref = jax.block_until_ready(agg_reference(params, h))
        max_err = float(jnp.max(jnp.abs(out[b] - ref[0])))
        assert max_err < 1e-3, f"patient {b}: mismatch vs reference: {max_err}"

    # Single-patient API parity check
    single = jax.block_until_ready(agg_forward(histories[0], packed))
    assert single.shape == (1, N_MED)

    print("KERNEL_OK")
</pallas_src>

<mosaic_0001>
module attributes {stable_mosaic.version = 11 : i64} {
  func.func @_agg_batch_kernel(%arg0: i32, %arg1: memref<128x256xf32, #tpu.memory_space<vmem>>, %arg2: memref<512x128xf32, #tpu.memory_space<vmem>>, %arg3: memref<128x128xf32, #tpu.memory_space<vmem>>) attributes {dimension_semantics = [#tpu.dimension_semantics<parallel>], iteration_bounds = array<i64: 1>, scalar_prefetch = 0 : i64, scratch_operands = 0 : i64, tpu.core_type = #tpu.core_type<tc>, window_params = [{transform_indices = @transform_0, window_bounds = array<i64: 128, 256>}, {pipeline_mode = #tpu.pipeline_mode<synchronous>, transform_indices = @transform_1, window_bounds = array<i64: 512, 128>}, {transform_indices = @transform_2, window_bounds = array<i64: 128, 128>}]} {
    %c0 = arith.constant 0 : index
    %c0_0 = arith.constant 0 : index
    %0 = vector.load %arg2[%c0, %c0_0] : memref<512x128xf32, #tpu.memory_space<vmem>>, vector<256x128xf32>
    %c256 = arith.constant 256 : index
    %c0_1 = arith.constant 0 : index
    %1 = vector.load %arg2[%c256, %c0_1] : memref<512x128xf32, #tpu.memory_space<vmem>>, vector<128x128xf32>
    %c384 = arith.constant 384 : index
    %c0_2 = arith.constant 0 : index
    %2 = vector.load %arg2[%c384, %c0_2] : memref<512x128xf32, #tpu.memory_space<vmem>>, vector<128x128xf32>
    %c0_3 = arith.constant 0 : index
    %c0_4 = arith.constant 0 : index
    %3 = vector.load %arg1[%c0_3, %c0_4] : memref<128x256xf32, #tpu.memory_space<vmem>>, vector<128x256xf32>
    %cst = arith.constant dense<0.000000e+00> : vector<128x128xf32>
    %4 = tpu.matmul %3, %0, %cst {dimension_numbers = #tpu.dot_dimension_numbers<[1], [0], [0], [1], [0, 0, 1, 1], [], []>} : vector<128x256xf32>, vector<256x128xf32>, vector<128x128xf32> -> vector<128x128xf32>
    %cst_5 = arith.constant 0.000000e+00 : f32
    %5 = vector.broadcast %cst_5 : f32 to vector<128x128xf32>
    %6 = arith.maximumf %4, %5 : vector<128x128xf32>
    %cst_6 = arith.constant dense<0.000000e+00> : vector<128x128xf32>
    %7 = tpu.matmul %6, %1, %cst_6 {dimension_numbers = #tpu.dot_dimension_numbers<[1], [0], [0], [1], [0, 0, 1, 1], [], []>} : vector<128x128xf32>, vector<128x128xf32>, vector<128x128xf32> -> vector<128x128xf32>
    %cst_7 = arith.constant 0.000000e+00 : f32
    %8 = vector.broadcast %cst_7 : f32 to vector<128x128xf32>
    %9 = arith.maximumf %7, %8 : vector<128x128xf32>
    %cst_8 = arith.constant dense<0.000000e+00> : vector<128x128xf32>
    %10 = tpu.matmul %9, %2, %cst_8 {dimension_numbers = #tpu.dot_dimension_numbers<[1], [0], [0], [1], [0, 0, 1, 1], [], []>} : vector<128x128xf32>, vector<128x128xf32>, vector<128x128xf32> -> vector<128x128xf32>
    %11 = arith.negf %10 : vector<128x128xf32>
    %12 = math.exp %11 : vector<128x128xf32>
    %cst_9 = arith.constant 1.000000e+00 : f32
    %13 = vector.broadcast %cst_9 : f32 to vector<128x128xf32>
    %14 = arith.addf %13, %12 : vector<128x128xf32>
    %15 = arith.divf %13, %14 : vector<128x128xf32>
    %c0_10 = arith.constant 0 : index
    %c0_11 = arith.constant 0 : index
    %16 = vector.load %arg3[%c0_10, %c0_11] : memref<128x128xf32, #tpu.memory_space<vmem>>, vector<128x128xf32>
    tpu.vector_store %arg3[%c0_10, %c0_11], %15 {strides = array<i32>} : memref<128x128xf32, #tpu.memory_space<vmem>>, vector<128x128xf32>,
    return
  }
  func.func @transform_0(%arg0: i32) -> (i32, i32) {
    %c0_i32 = arith.constant 0 : i32
    %c0_i32_0 = arith.constant 0 : i32
    return %arg0, %c0_i32 : i32, i32
  }
  func.func @transform_1(%arg0: i32) -> (i32, i32) {
    %c0_i32 = arith.constant 0 : i32
    %c0_i32_0 = arith.constant 0 : i32
    %c0_i32_1 = arith.constant 0 : i32
    return %c0_i32, %c0_i32_0 : i32, i32
  }
  func.func @transform_2(%arg0: i32) -> (i32, i32) {
    %c0_i32 = arith.constant 0 : i32
    %c0_i32_0 = arith.constant 0 : i32
    return %arg0, %c0_i32 : i32, i32
  }
}

</mosaic_0001>

<bundles_post_ra>
// kernel: _agg_pallas.1
= control target key start
LH: loop header
LB: loop body
LE: loop exit
PB: predicated region body
PF: predicated region fallthrough
CT: control target
= control target key end

     0   :  { %7 = vsyncpa [#allocation3], 0  ;;  %s974_s0 = inlined_call_operand.hbm [shape: f32[128,256], index: 0, kind: input, shape index: {}]   ;;  %s975_s1 = inlined_call_operand.hbm [shape: f32[512,128], index: 1, kind: input, shape index: {}]   ;;  %s976_s2 = inlined_call_operand.hbm [shape: f32[128,128], index: 2, kind: output, shape index: {}]  }
   0x1   :  { %8 = vsyncpa [#allocation6], 0 }
   0x2   :  { %9 = vsyncpa [#allocation4], 0  ;;  %s14_s11 = sshll.u32 %s974_s0, 4  ;;  %s937_s12 = smov [#allocation2]   ;;  %s15_s11 = int_to_ptr.hbm [resolvable:$true] %s14_s11 }
   0x3   :  { %s16_s13 = sshll.u32 %s937_s12, 4  ;;  %s27_s16 = sshll.u32 %s975_s1, 4  ;;  %s17_s13 = int_to_ptr.vmem [resolvable:$true] %s16_s13  ;;  %s28_s16 = int_to_ptr.hbm [resolvable:$true] %s27_s16 }
   0x4   :  { %s938_s17 = smov 256   ;;  %s939_s18 = smov 16  }
   0x5   :  { %22 = dma.hbm_to_vmem [thread:$0]  %s15_s11, 4096, %s17_s13, [#allocation3], %s938_s17, %s938_s17, %s939_s18  }
   0x6   :  { %s940_s19 = smov [#allocation5]   ;;  %s941_s21 = smov 128  }
   0x7   :  { %s29_s20 = sshll.u32 %s940_s19, 4  ;;  %s942_s22 = smov 8   ;;  %s30_s20 = int_to_ptr.vmem [resolvable:$true] %s29_s20 }
   0x8   :  { %35 = dma.hbm_to_vmem [thread:$0]  %s28_s16, 8192, %s30_s20, [#allocation6], %s941_s21, %s941_s21, %s942_s22  }
   0x9   :  { %931 = dma.done.wait [#allocation3], 4096  }
   0xa   :  { %932 = vsyncadd [#allocation3], 4294963200 }
   0xb   :  { %933 = dma.done.wait [#allocation6], 8192  }
   0xc   :  { %934 = vsyncadd [#allocation6], 4294959104  ;;  %v59_v0 = vld [vmem:[#allocation5 + $0x78] sm:$0xff]  ;;  %v58_v2 = vld [vmem:[#allocation5 + $0x70] sm:$0xff]  ;;  %s943_s0 = smov [#allocation7]   ;;  %s758_s25 = sshll.u32 %s976_s2, 4  ;;  %s759_s25 = int_to_ptr.hbm [resolvable:$true] %s758_s25 }
   0xd   :  { %v75_v1 = vld [vmem:[#allocation5 + $0xf8] sm:$0xff]  ;;  %140 = vmatpush.msra.mxu0 %v59_v0  ;;  %v74_v3 = vld [vmem:[#allocation5 + $0xf0] sm:$0xff]  ;;  %v57_v4 = vld [vmem:[#allocation5 + $0x68] sm:$0xff]  ;;  %s756_s1 = sshll.u32 %s943_s0, 4  ;;  %s757_s1 = int_to_ptr.vmem [resolvable:$true] %s756_s1 }
   0xe   :  { %205 = vmatpush.msra.mxu1 %v75_v1  ;;  %v73_v5 = vld [vmem:[#allocation5 + $0xe8] sm:$0xff]  ;;  %v56_v6 = vld [vmem:[#allocation5 + $0x60] sm:$0xff]  ;;  %v55_v8 = vld [vmem:[#allocation5 + $0x58] sm:$0xff] }
   0xf   :  { %141 = vmatpush.msra.mxu0 %v58_v2  ;;  %v72_v7 = vld [vmem:[#allocation5 + $0xe0] sm:$0xff]  ;;  %v71_v9 = vld [vmem:[#allocation5 + $0xd8] sm:$0xff]  ;;  %v54_v10 = vld [vmem:[#allocation5 + $0x50] sm:$0xff] }
  0x10   :  { %206 = vmatpush.msra.mxu1 %v74_v3  ;;  %v70_v11 = vld [vmem:[#allocation5 + $0xd0] sm:$0xff]  ;;  %v53_v12 = vld [vmem:[#allocation5 + $0x48] sm:$0xff]  ;;  %v52_v14 = vld [vmem:[#allocation5 + $0x40] sm:$0xff] }
  0x11   :  { %142 = vmatpush.msra.mxu0 %v57_v4  ;;  %v69_v13 = vld [vmem:[#allocation5 + $0xc8] sm:$0xff]  ;;  %v68_v15 = vld [vmem:[#allocation5 + $0xc0] sm:$0xff]  ;;  %v51_v16 = vld [vmem:[#allocation5 + $0x38] sm:$0xff] }
  0x12   :  { %207 = vmatpush.msra.mxu1 %v73_v5  ;;  %v67_v17 = vld [vmem:[#allocation5 + $0xb8] sm:$0xff]  ;;  %v50_v18 = vld [vmem:[#allocation5 + $0x30] sm:$0xff]  ;;  %v49_v20 = vld [vmem:[#allocation5 + $0x28] sm:$0xff] }
  0x13   :  { %143 = vmatpush.msra.mxu0 %v56_v6  ;;  %v66_v19 = vld [vmem:[#allocation5 + $0xb0] sm:$0xff]  ;;  %v65_v21 = vld [vmem:[#allocation5 + $0xa8] sm:$0xff]  ;;  %v48_v22 = vld [vmem:[#allocation5 + $0x20] sm:$0xff] }
  0x14   :  { %208 = vmatpush.msra.mxu1 %v72_v7  ;;  %v64_v23 = vld [vmem:[#allocation5 + $0xa0] sm:$0xff]  ;;  %v47_v24 = vld [vmem:[#allocation5 + $0x18] sm:$0xff]  ;;  %v46_v26 = vld [vmem:[#allocation5 + $0x10] sm:$0xff] }
  0x15   :  { %144 = vmatpush.msra.mxu0 %v55_v8  ;;  %v63_v25 = vld [vmem:[#allocation5 + $0x98] sm:$0xff]  ;;  %v62_v27 = vld [vmem:[#allocation5 + $0x90] sm:$0xff]  ;;  %v45_v28 = vld [vmem:[#allocation5 + $0x8] sm:$0xff] }
  0x16   :  { %209 = vmatpush.msra.mxu1 %v71_v9  ;;  %v61_v29 = vld [vmem:[#allocation5 + $0x88] sm:$0xff]  ;;  %v44_v30 = vld [vmem:[#allocation5] sm:$0xff]  ;;  %v110_v34 = vld [vmem:[#allocation2 + $0x10] sm:$0xff] }
  0x17   :  { %145 = vmatpush.msra.mxu0 %v54_v10  ;;  %v60_v31 = vld [vmem:[#allocation5 + $0x80] sm:$0xff]  ;;  %v109_v33 = vld [vmem:[#allocation2 + $0x8] sm:$0xff]  ;;  %v111_v35 = vld [vmem:[#allocation2 + $0x18] sm:$0xff] }
  0x18   :  { %210 = vmatpush.msra.mxu1 %v70_v11  ;;  %v108_v32 = vld [vmem:[#allocation2] sm:$0xff]  ;;  %v113_v37 = vld [vmem:[#allocation2 + $0x28] sm:$0xff]  ;;  %v114_v38 = vld [vmem:[#allocation2 + $0x30] sm:$0xff] }
  0x19   :  { %146 = vmatpush.msra.mxu0 %v53_v12  ;;  %v112_v36 = vld [vmem:[#allocation2 + $0x20] sm:$0xff]  ;;  %v115_v39 = vld [vmem:[#allocation2 + $0x38] sm:$0xff]  ;;  %v117_v41 = vld [vmem:[#allocation2 + $0x48] sm:$0xff] }
  0x1a   :  { %211 = vmatpush.msra.mxu1 %v69_v13  ;;  %v116_v40 = vld [vmem:[#allocation2 + $0x40] sm:$0xff]  ;;  %v118_v42 = vld [vmem:[#allocation2 + $0x50] sm:$0xff]  ;;  %v119_v43 = vld [vmem:[#allocation2 + $0x58] sm:$0xff] }
  0x1b   :  { %147 = vmatpush.msra.mxu0 %v52_v14  ;;  %v120_v44 = vld [vmem:[#allocation2 + $0x60] sm:$0xff]  ;;  %v121_v45 = vld [vmem:[#allocation2 + $0x68] sm:$0xff]  ;;  %v122_v46 = vld [vmem:[#allocation2 + $0x70] sm:$0xff] }
  0x1c   :  { %212 = vmatpush.msra.mxu1 %v68_v15  ;;  %v123_v47 = vld [vmem:[#allocation2 + $0x78] sm:$0xff]  ;;  %v124_v48 = vld [vmem:[#allocation2 + $0x80] sm:$0xff]  ;;  %v125_v49 = vld [vmem:[#allocation2 + $0x88] sm:$0xff] }
  0x1d   :  { %148 = vmatpush.msra.mxu0 %v51_v16  ;;  %v91_v50 = vld [vmem:[#allocation5 + $0x178] sm:$0xff]  ;;  %v90_v51 = vld [vmem:[#allocation5 + $0x170] sm:$0xff]  ;;  %v89_v52 = vld [vmem:[#allocation5 + $0x168] sm:$0xff] }
  0x1e   :  { %213 = vmatpush.msra.mxu1 %v67_v17  ;;  %286 = vmatpush.msra.mxu2 %v91_v50  ;;  %v126_v53 = vld [vmem:[#allocation2 + $0x90] sm:$0xff]  ;;  %v127_v54 = vld [vmem:[#allocation2 + $0x98] sm:$0xff]  ;;  %v88_v55 = vld [vmem:[#allocation5 + $0x160] sm:$0xff] }
  0x1f   :  { %149 = vmatpush.msra.mxu0 %v50_v18  ;;  %v87_v56 = vld [vmem:[#allocation5 + $0x158] sm:$0xff]  ;;  %v86_v57 = vld [vmem:[#allocation5 + $0x150] sm:$0xff]  ;;  %v85_v58 = vld [vmem:[#allocation5 + $0x148] sm:$0xff] }
  0x20   :  { %214 = vmatpush.msra.mxu1 %v66_v19  ;;  %287 = vmatpush.msra.mxu2 %v90_v51  ;;  %v128_v59 = vld [vmem:[#allocation2 + $0xa0] sm:$0xff]  ;;  %v129_v60 = vld [vmem:[#allocation2 + $0xa8] sm:$0xff]  ;;  %v83_v62 = vld [vmem:[#allocation5 + $0x138] sm:$0xff] }
  0x21   :  { %150 = vmatpush.msra.mxu0 %v49_v20  ;;  %v84_v61 = vld [vmem:[#allocation5 + $0x140] sm:$0xff]  ;;  %v82_v63 = vld [vmem:[#allocation5 + $0x130] sm:$0xff]  ;;  %v81_v0 = vld [vmem:[#allocation5 + $0x128] sm:$0xff] }
  0x22   :  { %215 = vmatpush.msra.mxu1 %v65_v21  ;;  %288 = vmatpush.msra.mxu2 %v89_v52  ;;  %v130_v1 = vld [vmem:[#allocation2 + $0xb0] sm:$0xff]  ;;  %v131_v2 = vld [vmem:[#allocation2 + $0xb8] sm:$0xff]  ;;  %v80_v3 = vld [vmem:[#allocation5 + $0x120] sm:$0xff] }
  0x23   :  { %151 = vmatpush.msra.mxu0 %v48_v22  ;;  %v79_v4 = vld [vmem:[#allocation5 + $0x118] sm:$0xff]  ;;  %v78_v5 = vld [vmem:[#allocation5 + $0x110] sm:$0xff]  ;;  %v132_v6 = vld [vmem:[#allocation2 + $0xc0] sm:$0xff] }
  0x24   :  { %216 = vmatpush.msra.mxu1 %v64_v23  ;;  %289 = vmatpush.msra.mxu2 %v88_v55  ;;  %v133_v7 = vld [vmem:[#allocation2 + $0xc8] sm:$0xff]  ;;  %v76_v9 = vld [vmem:[#allocation5 + $0x100] sm:$0xff]  ;;  %v134_v10 = vld [vmem:[#allocation2 + $0xd0] sm:$0xff] }
  0x25   :  { %152 = vmatpush.msra.mxu0 %v47_v24  ;;  %v77_v8 = vld [vmem:[#allocation5 + $0x108] sm:$0xff]  ;;  %v135_v11 = vld [vmem:[#allocation2 + $0xd8] sm:$0xff]  ;;  %v136_v12 = vld [vmem:[#allocation2 + $0xe0] sm:$0xff] }
  0x26   :  { %217 = vmatpush.msra.mxu1 %v63_v25  ;;  %290 = vmatpush.msra.mxu2 %v87_v56  ;;  %v137_v13 = vld [vmem:[#allocation2 + $0xe8] sm:$0xff]  ;;  %v138_v14 = vld [vmem:[#allocation2 + $0xf0] sm:$0xff]  ;;  %v139_v15 = vld [vmem:[#allocation2 + $0xf8] sm:$0xff] }
  0x27   :  { %153 = vmatpush.msra.mxu0 %v46_v26  ;;  %v107_v56 = vld [vmem:[#allocation5 + $0x1f8] sm:$0xff] }
  0x28   :  { %218 = vmatpush.msra.mxu1 %v62_v27  ;;  %291 = vmatpush.msra.mxu2 %v86_v57  ;;  %v106_v57 = vld [vmem:[#allocation5 + $0x1f0] sm:$0xff] }
  0x29   :  { %154 = vmatpush.msra.mxu0 %v45_v28  ;;  %367 = vmatpush.msra.mxu3 %v107_v56 }
  0x2a   :  { %219 = vmatpush.msra.mxu1 %v61_v29  ;;  %292 = vmatpush.msra.mxu2 %v85_v58  ;;  %v105_v58 = vld [vmem:[#allocation5 + $0x1e8] sm:$0xff] }
  0x2b   :  { %155 = vmatpush.msra.mxu0 %v44_v30  ;;  %368 = vmatpush.msra.mxu3 %v106_v57 }
  0x2c   :  { %220 = vmatpush.msra.mxu1 %v60_v31  ;;  %156 = vmatmul.f32.vlgmr.msra.gmra.mxu0 %v108_v32 }
  0x2d   :  { %221 = vmatmul.f32.vlgmr.msra.gmra.mxu1 %v109_v33  ;;  %293 = vmatpush.msra.mxu2 %v84_v61 }
  0x2e   :  { %369 = vmatpush.msra.mxu3 %v105_v58 }
  0x2f   :  { %294 = vmatpush.msra.mxu2 %v83_v62  ;;  %v104_v62 = vld [vmem:[#allocation5 + $0x1e0] sm:$0xff] }
  0x30   :  { %370 = vmatpush.msra.mxu3 %v104_v62 }
  0x31   :  { %295 = vmatpush.msra.mxu2 %v82_v63 }
  0x33   :  { %296 = vmatpush.msra.mxu2 %v81_v0  ;;  %v103_v0 = vld [vmem:[#allocation5 + $0x1d8] sm:$0xff] }
  0x34   :  { %159 = vmatmul.f32.gmra.mxu0 %v110_v34  ;;  %371 = vmatpush.msra.mxu3 %v103_v0 }
  0x35   :  { %224 = vmatmul.f32.gmra.mxu1 %v111_v35  ;;  %297 = vmatpush.msra.mxu2 %v80_v3 }
  0x37   :  { %298 = vmatpush.msra.mxu2 %v79_v4 }
  0x39   :  { %299 = vmatpush.msra.mxu2 %v78_v5 }
  0x3b   :  { %300 = vmatpush.msra.mxu2 %v77_v8  ;;  %v99_v8 = vld [vmem:[#allocation5 + $0x1b8] sm:$0xff] }
  0x3c   :  { %162 = vmatmul.f32.gmra.mxu0 %v112_v36 }
  0x3d   :  { %227 = vmatmul.f32.gmra.mxu1 %v113_v37  ;;  %301 = vmatpush.msra.mxu2 %v76_v9  ;;  %v98_v9 = vld [vmem:[#allocation5 + $0x1b0] sm:$0xff] }
  0x44   :  { %165 = vmatmul.f32.gmra.mxu0 %v114_v38 }
  0x45   :  { %230 = vmatmul.f32.gmra.mxu1 %v115_v39 }
  0x4c   :  { %168 = vmatmul.f32.gmra.mxu0 %v116_v40 }
  0x4d   :  { %233 = vmatmul.f32.gmra.mxu1 %v117_v41 }
  0x54   :  { %171 = vmatmul.f32.gmra.mxu0 %v118_v42 }
  0x55   :  { %236 = vmatmul.f32.gmra.mxu1 %v119_v43 }
  0x5c   :  { %174 = vmatmul.f32.gmra.mxu0 %v120_v44 }
  0x5d   :  { %239 = vmatmul.f32.gmra.mxu1 %v121_v45 }
  0x64   :  { %177 = vmatmul.f32.gmra.mxu0 %v122_v46 }
  0x65   :  { %242 = vmatmul.f32.gmra.mxu1 %v123_v47 }
  0x6c   :  { %180 = vmatmul.f32.gmra.mxu0 %v124_v48 }
  0x6d   :  { %245 = vmatmul.f32.gmra.mxu1 %v125_v49 }
  0x74   :  { %183 = vmatmul.f32.gmra.mxu0 %v126_v53 }
  0x75   :  { %248 = vmatmul.f32.gmra.mxu1 %v127_v54 }
  0x7c   :  { %186 = vmatmul.f32.gmra.mxu0 %v128_v59 }
  0x7d   :  { %251 = vmatmul.f32.gmra.mxu1 %v129_v60 }
  0x84   :  { %189 = vmatmul.f32.gmra.mxu0 %v130_v1  ;;  %v102_v1 = vld [vmem:[#allocation5 + $0x1d0] sm:$0xff] }
  0x85   :  { %254 = vmatmul.f32.gmra.mxu1 %v131_v2  ;;  %372 = vmatpush.msra.mxu3 %v102_v1  ;;  %v101_v2 = vld [vmem:[#allocation5 + $0x1c8] sm:$0xff] }
  0x87   :  { %373 = vmatpush.msra.mxu3 %v101_v2 }
  0x8c   :  { %192 = vmatmul.f32.gmra.mxu0 %v132_v6  ;;  %v100_v6 = vld [vmem:[#allocation5 + $0x1c0] sm:$0xff] }
  0x8d   :  { %257 = vmatmul.f32.gmra.mxu1 %v133_v7  ;;  %374 = vmatpush.msra.mxu3 %v100_v6 }
  0x8f   :  { %375 = vmatpush.msra.mxu3 %v99_v8 }
  0x91   :  { %376 = vmatpush.msra.mxu3 %v98_v9 }
  0x94   :  { %195 = vmatmul.f32.gmra.mxu0 %v134_v10  ;;  %v97_v10 = vld [vmem:[#allocation5 + $0x1a8] sm:$0xff] }
  0x95   :  { %260 = vmatmul.f32.gmra.mxu1 %v135_v11  ;;  %v96_v11 = vld [vmem:[#allocation5 + $0x1a0] sm:$0xff]  ;;  %377 = vmatpush.msra.mxu3 %v97_v10 }
  0x97   :  { %378 = vmatpush.msra.mxu3 %v96_v11 }
  0x9c   :  { %198 = vmatmul.f32.gmra.mxu0 %v136_v12 }
  0x9d   :  { %263 = vmatmul.f32.gmra.mxu1 %v137_v13 }
  0xa4   :  { %201 = vmatmul.f32.gmra.mxu0 %v138_v14 }
  0xa5   :  { %266 = vmatmul.f32.gmra.mxu1 %v139_v15  ;;  %v95_v15 = vld [vmem:[#allocation5 + $0x198] sm:$0xff] }
  0xa6   :  { %379 = vmatpush.msra.mxu3 %v95_v15 }
  0xa9   :  { %v157_v16 = vpop.f32.mrf.mxu0 }
  0xaa   :  { %v222_v17 = vpop.f32.mrf.mxu1 }
  0xab   :  { %v223_v18 = vadd.f32 %v222_v17, %v157_v16  ;;  %v94_v17 = vld [vmem:[#allocation5 + $0x190] sm:$0xff] }
  0xac   :  { %380 = vmatpush.msra.mxu3 %v94_v17 }
  0xad   :  { %v270_v19 = vmax.f32 %v223_v18, 0.0  ;;  %v93_v18 = vld [vmem:[#allocation5 + $0x188] sm:$0xff] }
  0xae   :  { %381 = vmatpush.msra.mxu3 %v93_v18 }
  0xaf   :  { %302 = vmatmul.f32.vlgmr.msra.gmra.mxu2 %v270_v19 }
  0xb1   :  { %v160_v20 = vpop.f32.mrf.mxu0 }
  0xb2   :  { %v225_v21 = vpop.f32.mrf.mxu1 }
  0xb3   :  { %v226_v22 = vadd.f32 %v225_v21, %v160_v20 }
  0xb5   :  { %v271_v23 = vmax.f32 %v226_v22, 0.0  ;;  %v92_v22 = vld [vmem:[#allocation5 + $0x180] sm:$0xff] }
  0xb6   :  { %382 = vmatpush.msra.mxu3 %v92_v22 }
  0xb7   :  { %305 = vmatmul.f32.gmra.mxu2 %v271_v23 }
  0xb9   :  { %v163_v24 = vpop.f32.mrf.mxu0 }
  0xba   :  { %v228_v25 = vpop.f32.mrf.mxu1 }
  0xbb   :  { %v229_v26 = vadd.f32 %v228_v25, %v163_v24 }
  0xbd   :  { %v272_v27 = vmax.f32 %v229_v26, 0.0 }
  0xbf   :  { %308 = vmatmul.f32.gmra.mxu2 %v272_v27 }
  0xc1   :  { %v166_v28 = vpop.f32.mrf.mxu0 }
  0xc2   :  { %v231_v29 = vpop.f32.mrf.mxu1 }
  0xc3   :  { %v232_v30 = vadd.f32 %v231_v29, %v166_v28 }
  0xc5   :  { %v273_v31 = vmax.f32 %v232_v30, 0.0 }
  0xc7   :  { %311 = vmatmul.f32.gmra.mxu2 %v273_v31 }
  0xc9   :  { %v169_v32 = vpop.f32.mrf.mxu0 }
  0xca   :  { %v234_v33 = vpop.f32.mrf.mxu1 }
  0xcb   :  { %v235_v34 = vadd.f32 %v234_v33, %v169_v32 }
  0xcd   :  { %v274_v35 = vmax.f32 %v235_v34, 0.0 }
  0xcf   :  { %314 = vmatmul.f32.gmra.mxu2 %v274_v35 }
  0xd1   :  { %v172_v36 = vpop.f32.mrf.mxu0 }
  0xd2   :  { %v237_v37 = vpop.f32.mrf.mxu1 }
  0xd3   :  { %v238_v38 = vadd.f32 %v237_v37, %v172_v36 }
  0xd5   :  { %v275_v39 = vmax.f32 %v238_v38, 0.0 }
  0xd7   :  { %317 = vmatmul.f32.gmra.mxu2 %v275_v39 }
  0xd9   :  { %v175_v40 = vpop.f32.mrf.mxu0 }
  0xda   :  { %v240_v41 = vpop.f32.mrf.mxu1 }
  0xdb   :  { %v241_v42 = vadd.f32 %v240_v41, %v175_v40 }
  0xdd   :  { %v276_v43 = vmax.f32 %v241_v42, 0.0 }
  0xdf   :  { %320 = vmatmul.f32.gmra.mxu2 %v276_v43 }
  0xe1   :  { %v178_v44 = vpop.f32.mrf.mxu0 }
  0xe2   :  { %v243_v45 = vpop.f32.mrf.mxu1 }
  0xe3   :  { %v244_v46 = vadd.f32 %v243_v45, %v178_v44 }
  0xe5   :  { %v277_v47 = vmax.f32 %v244_v46, 0.0 }
  0xe7   :  { %323 = vmatmul.f32.gmra.mxu2 %v277_v47 }
  0xe9   :  { %v181_v48 = vpop.f32.mrf.mxu0 }
  0xea   :  { %v246_v49 = vpop.f32.mrf.mxu1 }
  0xeb   :  { %v247_v50 = vadd.f32 %v246_v49, %v181_v48 }
  0xed   :  { %v278_v51 = vmax.f32 %v247_v50, 0.0 }
  0xef   :  { %326 = vmatmul.f32.gmra.mxu2 %v278_v51 }
  0xf1   :  { %v184_v52 = vpop.f32.mrf.mxu0 }
  0xf2   :  { %v249_v53 = vpop.f32.mrf.mxu1 }
  0xf3   :  { %v250_v54 = vadd.f32 %v249_v53, %v184_v52 }
  0xf5   :  { %v279_v55 = vmax.f32 %v250_v54, 0.0 }
  0xf7   :  { %329 = vmatmul.f32.gmra.mxu2 %v279_v55 }
  0xf9   :  { %v187_v59 = vpop.f32.mrf.mxu0 }
  0xfa   :  { %v252_v60 = vpop.f32.mrf.mxu1 }
  0xfb   :  { %v253_v61 = vadd.f32 %v252_v60, %v187_v59 }
  0xfd   :  { %v280_v63 = vmax.f32 %v253_v61, 0.0 }
  0xff   :  { %332 = vmatmul.f32.gmra.mxu2 %v280_v63 }
 0x101   :  { %v190_v3 = vpop.f32.mrf.mxu0 }
 0x102   :  { %v255_v4 = vpop.f32.mrf.mxu1 }
 0x103   :  { %v256_v5 = vadd.f32 %v255_v4, %v190_v3 }
 0x105   :  { %v281_v7 = vmax.f32 %v256_v5, 0.0 }
 0x107   :  { %335 = vmatmul.f32.gmra.mxu2 %v281_v7 }
 0x109   :  { %v193_v12 = vpop.f32.mrf.mxu0 }
 0x10a   :  { %v258_v13 = vpop.f32.mrf.mxu1 }
 0x10b   :  { %v259_v14 = vadd.f32 %v258_v13, %v193_v12 }
 0x10d   :  { %v282_v16 = vmax.f32 %v259_v14, 0.0 }
 0x10f   :  { %338 = vmatmul.f32.gmra.mxu2 %v282_v16 }
 0x111   :  { %v196_v19 = vpop.f32.mrf.mxu0 }
 0x112   :  { %v261_v20 = vpop.f32.mrf.mxu1 }
 0x113   :  { %v262_v21 = vadd.f32 %v261_v20, %v196_v19 }
 0x115   :  { %v283_v23 = vmax.f32 %v262_v21, 0.0 }
 0x117   :  { %341 = vmatmul.f32.gmra.mxu2 %v283_v23 }
 0x119   :  { %v199_v24 = vpop.f32.mrf.mxu0 }
 0x11a   :  { %v264_v25 = vpop.f32.mrf.mxu1 }
 0x11b   :  { %v265_v26 = vadd.f32 %v264_v25, %v199_v24 }
 0x11d   :  { %v284_v27 = vmax.f32 %v265_v26, 0.0 }
 0x11f   :  { %344 = vmatmul.f32.gmra.mxu2 %v284_v27 }
 0x121   :  { %v202_v28 = vpop.f32.mrf.mxu0 }
 0x122   :  { %v267_v29 = vpop.f32.mrf.mxu1 }
 0x123   :  { %v268_v30 = vadd.f32 %v267_v29, %v202_v28 }
 0x125   :  { %v285_v31 = vmax.f32 %v268_v30, 0.0 }
 0x127   :  { %347 = vmatmul.f32.gmra.mxu2 %v285_v31 }
 0x132   :  { %v303_v32 = vpop.f32.mrf.mxu2 }
 0x133   :  { %v351_v33 = vmax.f32 %v303_v32, 0.0 }
 0x135   :  { %383 = vmatmul.f32.vlgmr.msra.gmra.mxu3 %v351_v33 }
 0x13a   :  { %v306_v34 = vpop.f32.mrf.mxu2 }
 0x13b   :  { %v352_v35 = vmax.f32 %v306_v34, 0.0 }
 0x13d   :  { %386 = vmatmul.f32.gmra.mxu3 %v352_v35 }
 0x142   :  { %v309_v36 = vpop.f32.mrf.mxu2 }
 0x143   :  { %v353_v37 = vmax.f32 %v309_v36, 0.0 }
 0x145   :  { %389 = vmatmul.f32.gmra.mxu3 %v353_v37 }
 0x14a   :  { %v312_v38 = vpop.f32.mrf.mxu2 }
 0x14b   :  { %v354_v39 = vmax.f32 %v312_v38, 0.0 }
 0x14d   :  { %392 = vmatmul.f32.gmra.mxu3 %v354_v39 }
 0x152   :  { %v315_v40 = vpop.f32.mrf.mxu2 }
 0x153   :  { %v355_v41 = vmax.f32 %v315_v40, 0.0 }
 0x155   :  { %395 = vmatmul.f32.gmra.mxu3 %v355_v41 }
 0x15a   :  { %v318_v42 = vpop.f32.mrf.mxu2 }
 0x15b   :  { %v356_v43 = vmax.f32 %v318_v42, 0.0 }
 0x15d   :  { %398 = vmatmul.f32.gmra.mxu3 %v356_v43 }
 0x162   :  { %v321_v44 = vpop.f32.mrf.mxu2 }
 0x163   :  { %v357_v45 = vmax.f32 %v321_v44, 0.0 }
 0x165   :  { %401 = vmatmul.f32.gmra.mxu3 %v357_v45 }
 0x16a   :  { %v324_v46 = vpop.f32.mrf.mxu2 }
 0x16b   :  { %v358_v47 = vmax.f32 %v324_v46, 0.0 }
 0x16d   :  { %404 = vmatmul.f32.gmra.mxu3 %v358_v47 }
 0x172   :  { %v327_v48 = vpop.f32.mrf.mxu2 }
 0x173   :  { %v359_v49 = vmax.f32 %v327_v48, 0.0 }
 0x175   :  { %407 = vmatmul.f32.gmra.mxu3 %v359_v49 }
 0x17a   :  { %v330_v50 = vpop.f32.mrf.mxu2 }
 0x17b   :  { %v360_v51 = vmax.f32 %v330_v50, 0.0 }
 0x17d   :  { %410 = vmatmul.f32.gmra.mxu3 %v360_v51 }
 0x182   :  { %v333_v52 = vpop.f32.mrf.mxu2 }
 0x183   :  { %v361_v53 = vmax.f32 %v333_v52, 0.0 }
 0x185   :  { %413 = vmatmul.f32.gmra.mxu3 %v361_v53 }
 0x18a   :  { %v336_v54 = vpop.f32.mrf.mxu2 }
 0x18b   :  { %v362_v55 = vmax.f32 %v336_v54, 0.0 }
 0x18d   :  { %416 = vmatmul.f32.gmra.mxu3 %v362_v55 }
 0x192   :  { %v339_v56 = vpop.f32.mrf.mxu2 }
 0x193   :  { %v363_v57 = vmax.f32 %v339_v56, 0.0 }
 0x195   :  { %419 = vmatmul.f32.gmra.mxu3 %v363_v57 }
 0x19a   :  { %v342_v58 = vpop.f32.mrf.mxu2 }
 0x19b   :  { %v364_v59 = vmax.f32 %v342_v58, 0.0 }
 0x19d   :  { %422 = vmatmul.f32.gmra.mxu3 %v364_v59 }
 0x1a2   :  { %v345_v60 = vpop.f32.mrf.mxu2 }
 0x1a3   :  { %v365_v61 = vmax.f32 %v345_v60, 0.0 }
 0x1a5   :  { %425 = vmatmul.f32.gmra.mxu3 %v365_v61 }
 0x1aa   :  { %v348_v62 = vpop.f32.mrf.mxu2 }
 0x1ab   :  { %v366_v63 = vmax.f32 %v348_v62, 0.0 }
 0x1ad   :  { %428 = vmatmul.f32.gmra.mxu3 %v366_v63 }
 0x1b8   :  { %v384_v0 = vpop.f32.mrf.mxu3 }
 0x1b9   :  { %v772_v1 = vmul.f32 -1.442695, %v384_v0 }
 0x1bb   :  { %795 = vpow2.f32 %v772_v1 }
 0x1c0   :  { %v387_v2 = vpop.f32.mrf.mxu3 }
 0x1c1   :  { %v796_v3 = vpop.eup %795  ;;  %v773_v4 = vmul.f32 -1.442695, %v387_v2 }
 0x1c2   :  { %v480_v5 = vadd.f32 1.0, %v796_v3 }
 0x1c3   :  { %797 = vpow2.f32 %v773_v4 }
 0x1c4   :  { %799 = vrcp.f32 %v480_v5  ;;  %v507_v13 = vand.u32 2147483648, %v480_v5  ;;  %v505_v15 = vand.u32 2147483647, %v480_v5  ;;  %vm501_vm1 = vweird.f32 %v480_v5 }
 0x1c6   :  { %v508_v21 = vor.u32 1.1754944e-38, %v507_v13  ;;  %vm506_vm3 = vcmp.eq.f32.partialorder %v505_v15, 8.507059e+37 }
 0x1c8   :  { %v390_v6 = vpop.f32.mrf.mxu3 }
 0x1c9   :  { %v798_v7 = vpop.eup %797  ;;  %v774_v8 = vmul.f32 -1.442695, %v390_v6 }
 0x1ca   :  { %v800_v9 = vpop.eup %799  ;;  %v481_v10 = vadd.f32 1.0, %v798_v7 }
 0x1cb   :  { %v497_v11 = vmul.f32 %v800_v9, %v480_v5  ;;  %801 = vpow2.f32 %v774_v8  ;;  %vm502_vm0 = vweird.f32 %v800_v9 }
 0x1cc   :  { %803 = vrcp.f32 %v481_v10  ;;  %vm503_vm2 = vmor %vm501_vm1, %vm502_vm0  ;;  %v522_v27 = vand.u32 2147483648, %v481_v10  ;;  %v520_v29 = vand.u32 2147483647, %v481_v10  ;;  %vm516_vm5 = vweird.f32 %v481_v10 }
 0x1cd   :  { %v498_v12 = vsub.f32 1.0, %v497_v11 }
 0x1ce   :  { %v523_v35 = vor.u32 1.1754944e-38, %v522_v27  ;;  %vm521_vm7 = vcmp.eq.f32.partialorder %v520_v29, 8.507059e+37 }
 0x1cf   :  { %v499_v14 = vmul.f32 %v800_v9, %v498_v12 }
 0x1d0   :  { %v393_v16 = vpop.f32.mrf.mxu3 }
 0x1d1   :  { %v802_v17 = vpop.eup %801  ;;  %v500_v18 = vadd.f32 %v800_v9, %v499_v14  ;;  %v775_v19 = vmul.f32 -1.442695, %v393_v16 }
 0x1d2   :  { %v804_v20 = vpop.eup %803  ;;  %v482_v22 = vadd.f32 1.0, %v802_v17 }
 0x1d3   :  { %v504_v23 = vsel %vm503_vm2, %v800_v9, %v500_v18  ;;  %v512_v24 = vmul.f32 %v804_v20, %v481_v10  ;;  %805 = vpow2.f32 %v775_v19  ;;  %vm517_vm4 = vweird.f32 %v804_v20 }
 0x1d4   :  { %v509_v25 = vsel %vm506_vm3, %v508_v21, %v504_v23  ;;  %807 = vrcp.f32 %v482_v22  ;;  %vm518_vm6 = vmor %vm516_vm5, %vm517_vm4  ;;  %v537_v41 = vand.u32 2147483648, %v482_v22  ;;  %v535_v43 = vand.u32 2147483647, %v482_v22 }
 0x1d5   :  { %736 = vst [vmem:[#allocation7] sm:$0xff] %v509_v25  ;;  %v513_v26 = vsub.f32 1.0, %v512_v24  ;;  %vm531_vm9 = vweird.f32 %v482_v22 }
 0x1d6   :  { %v538_v49 = vor.u32 1.1754944e-38, %v537_v41  ;;  %vm536_vm11 = vcmp.eq.f32.partialorder %v535_v43, 8.507059e+37 }
 0x1d7   :  { %v514_v28 = vmul.f32 %v804_v20, %v513_v26 }
 0x1d8   :  { %v396_v30 = vpop.f32.mrf.mxu3 }
 0x1d9   :  { %v806_v31 = vpop.eup %805  ;;  %v515_v32 = vadd.f32 %v804_v20, %v514_v28  ;;  %v776_v33 = vmul.f32 -1.442695, %v396_v30 }
 0x1da   :  { %v808_v34 = vpop.eup %807  ;;  %v483_v36 = vadd.f32 1.0, %v806_v31 }
 0x1db   :  { %v519_v37 = vsel %vm518_vm6, %v804_v20, %v515_v32  ;;  %v527_v38 = vmul.f32 %v808_v34, %v482_v22  ;;  %809 = vpow2.f32 %v776_v33  ;;  %vm532_vm8 = vweird.f32 %v808_v34 }
 0x1dc   :  { %v524_v39 = vsel %vm521_vm7, %v523_v35, %v519_v37  ;;  %811 = vrcp.f32 %v483_v36  ;;  %vm533_vm10 = vmor %vm531_vm9, %vm532_vm8  ;;  %v552_v55 = vand.u32 2147483648, %v483_v36  ;;  %v550_v57 = vand.u32 2147483647, %v483_v36 }
 0x1dd   :  { %737 = vst [vmem:[#allocation7 + $0x8] sm:$0xff] %v524_v39  ;;  %v528_v40 = vsub.f32 1.0, %v527_v38  ;;  %vm546_vm13 = vweird.f32 %v483_v36 }
 0x1de   :  { %v553_v63 = vor.u32 1.1754944e-38, %v552_v55  ;;  %vm551_vm15 = vcmp.eq.f32.partialorder %v550_v57, 8.507059e+37 }
 0x1df   :  { %v529_v42 = vmul.f32 %v808_v34, %v528_v40 }
 0x1e0   :  { %v399_v44 = vpop.f32.mrf.mxu3 }
 0x1e1   :  { %v810_v45 = vpop.eup %809  ;;  %v530_v46 = vadd.f32 %v808_v34, %v529_v42  ;;  %v777_v47 = vmul.f32 -1.442695, %v399_v44 }
 0x1e2   :  { %v812_v48 = vpop.eup %811  ;;  %v484_v50 = vadd.f32 1.0, %v810_v45 }
 0x1e3   :  { %v534_v51 = vsel %vm533_vm10, %v808_v34, %v530_v46  ;;  %v542_v52 = vmul.f32 %v812_v48, %v483_v36  ;;  %813 = vpow2.f32 %v777_v47  ;;  %vm547_vm12 = vweird.f32 %v812_v48 }
 0x1e4   :  { %v539_v53 = vsel %vm536_vm11, %v538_v49, %v534_v51  ;;  %815 = vrcp.f32 %v484_v50  ;;  %vm548_vm14 = vmor %vm546_vm13, %vm547_vm12  ;;  %v567_v5 = vand.u32 2147483648, %v484_v50  ;;  %v565_v7 = vand.u32 2147483647, %v484_v50 }
 0x1e5   :  { %738 = vst [vmem:[#allocation7 + $0x10] sm:$0xff] %v539_v53  ;;  %v543_v54 = vsub.f32 1.0, %v542_v52  ;;  %vm561_vm1 = vweird.f32 %v484_v50 }
 0x1e6   :  { %v568_v13 = vor.u32 1.1754944e-38, %v567_v5  ;;  %vm566_vm3 = vcmp.eq.f32.partialorder %v565_v7, 8.507059e+37 }
 0x1e7   :  { %v544_v56 = vmul.f32 %v812_v48, %v543_v54 }
 0x1e8   :  { %v402_v58 = vpop.f32.mrf.mxu3 }
 0x1e9   :  { %v814_v59 = vpop.eup %813  ;;  %v545_v60 = vadd.f32 %v812_v48, %v544_v56  ;;  %v778_v61 = vmul.f32 -1.442695, %v402_v58 }
 0x1ea   :  { %v816_v62 = vpop.eup %815  ;;  %v485_v0 = vadd.f32 1.0, %v814_v59 }
 0x1eb   :  { %v549_v1 = vsel %vm548_vm14, %v812_v48, %v545_v60  ;;  %v557_v2 = vmul.f32 %v816_v62, %v484_v50  ;;  %817 = vpow2.f32 %v778_v61  ;;  %vm562_vm0 = vweird.f32 %v816_v62 }
 0x1ec   :  { %v554_v3 = vsel %vm551_vm15, %v553_v63, %v549_v1  ;;  %819 = vrcp.f32 %v485_v0  ;;  %vm563_vm2 = vmor %vm561_vm1, %vm562_vm0  ;;  %v582_v19 = vand.u32 2147483648, %v485_v0  ;;  %v580_v21 = vand.u32 2147483647, %v485_v0 }
 0x1ed   :  { %739 = vst [vmem:[#allocation7 + $0x18] sm:$0xff] %v554_v3  ;;  %v558_v4 = vsub.f32 1.0, %v557_v2  ;;  %vm576_vm5 = vweird.f32 %v485_v0 }
 0x1ee   :  { %v583_v27 = vor.u32 1.1754944e-38, %v582_v19  ;;  %vm581_vm7 = vcmp.eq.f32.partialorder %v580_v21, 8.507059e+37 }
 0x1ef   :  { %v559_v6 = vmul.f32 %v816_v62, %v558_v4 }
 0x1f0   :  { %v405_v8 = vpop.f32.mrf.mxu3 }
 0x1f1   :  { %v818_v9 = vpop.eup %817  ;;  %v560_v10 = vadd.f32 %v816_v62, %v559_v6  ;;  %v779_v11 = vmul.f32 -1.442695, %v405_v8 }
 0x1f2   :  { %v820_v12 = vpop.eup %819  ;;  %v486_v14 = vadd.f32 1.0, %v818_v9 }
 0x1f3   :  { %v564_v15 = vsel %vm563_vm2, %v816_v62, %v560_v10  ;;  %v572_v16 = vmul.f32 %v820_v12, %v485_v0  ;;  %821 = vpow2.f32 %v779_v11  ;;  %vm577_vm4 = vweird.f32 %v820_v12 }
 0x1f4   :  { %v569_v17 = vsel %vm566_vm3, %v568_v13, %v564_v15  ;;  %823 = vrcp.f32 %v486_v14  ;;  %vm578_vm6 = vmor %vm576_vm5, %vm577_vm4  ;;  %v597_v33 = vand.u32 2147483648, %v486_v14  ;;  %v595_v35 = vand.u32 2147483647, %v486_v14 }
 0x1f5   :  { %740 = vst [vmem:[#allocation7 + $0x20] sm:$0xff] %v569_v17  ;;  %v573_v18 = vsub.f32 1.0, %v572_v16  ;;  %vm591_vm9 = vweird.f32 %v486_v14 }
 0x1f6   :  { %v598_v41 = vor.u32 1.1754944e-38, %v597_v33  ;;  %vm596_vm11 = vcmp.eq.f32.partialorder %v595_v35, 8.507059e+37 }
 0x1f7   :  { %v574_v20 = vmul.f32 %v820_v12, %v573_v18 }
 0x1f8   :  { %v408_v22 = vpop.f32.mrf.mxu3 }
 0x1f9   :  { %v822_v23 = vpop.eup %821  ;;  %v575_v24 = vadd.f32 %v820_v12, %v574_v20  ;;  %v780_v25 = vmul.f32 -1.442695, %v408_v22 }
 0x1fa   :  { %v824_v26 = vpop.eup %823  ;;  %v487_v28 = vadd.f32 1.0, %v822_v23 }
 0x1fb   :  { %v579_v29 = vsel %vm578_vm6, %v820_v12, %v575_v24  ;;  %v587_v30 = vmul.f32 %v824_v26, %v486_v14  ;;  %825 = vpow2.f32 %v780_v25  ;;  %vm592_vm8 = vweird.f32 %v824_v26 }
 0x1fc   :  { %v584_v31 = vsel %vm581_vm7, %v583_v27, %v579_v29  ;;  %827 = vrcp.f32 %v487_v28  ;;  %vm593_vm10 = vmor %vm591_vm9, %vm592_vm8  ;;  %v612_v47 = vand.u32 2147483648, %v487_v28  ;;  %v610_v49 = vand.u32 2147483647, %v487_v28 }
 0x1fd   :  { %741 = vst [vmem:[#allocation7 + $0x28] sm:$0xff] %v584_v31  ;;  %v588_v32 = vsub.f32 1.0, %v587_v30  ;;  %vm606_vm13 = vweird.f32 %v487_v28 }
 0x1fe   :  { %v613_v55 = vor.u32 1.1754944e-38, %v612_v47  ;;  %vm611_vm15 = vcmp.eq.f32.partialorder %v610_v49, 8.507059e+37 }
 0x1ff   :  { %v589_v34 = vmul.f32 %v824_v26, %v588_v32 }
 0x200   :  { %v411_v36 = vpop.f32.mrf.mxu3 }
 0x201   :  { %v826_v37 = vpop.eup %825  ;;  %v590_v38 = vadd.f32 %v824_v26, %v589_v34  ;;  %v781_v39 = vmul.f32 -1.442695, %v411_v36 }
 0x202   :  { %v828_v40 = vpop.eup %827  ;;  %v488_v42 = vadd.f32 1.0, %v826_v37 }
 0x203   :  { %v594_v43 = vsel %vm593_vm10, %v824_v26, %v590_v38  ;;  %v602_v44 = vmul.f32 %v828_v40, %v487_v28  ;;  %829 = vpow2.f32 %v781_v39  ;;  %vm607_vm12 = vweird.f32 %v828_v40 }
 0x204   :  { %v599_v45 = vsel %vm596_vm11, %v598_v41, %v594_v43  ;;  %831 = vrcp.f32 %v488_v42  ;;  %vm608_vm14 = vmor %vm606_vm13, %vm607_vm12  ;;  %v627_v61 = vand.u32 2147483648, %v488_v42  ;;  %v625_v63 = vand.u32 2147483647, %v488_v42 }
 0x205   :  { %742 = vst [vmem:[#allocation7 + $0x30] sm:$0xff] %v599_v45  ;;  %v603_v46 = vsub.f32 1.0, %v602_v44  ;;  %vm621_vm1 = vweird.f32 %v488_v42 }
 0x206   :  { %v628_v5 = vor.u32 1.1754944e-38, %v627_v61  ;;  %vm626_vm3 = vcmp.eq.f32.partialorder %v625_v63, 8.507059e+37 }
 0x207   :  { %v604_v48 = vmul.f32 %v828_v40, %v603_v46 }
 0x208   :  { %v414_v50 = vpop.f32.mrf.mxu3 }
 0x209   :  { %v830_v51 = vpop.eup %829  ;;  %v605_v52 = vadd.f32 %v828_v40, %v604_v48  ;;  %v782_v53 = vmul.f32 -1.442695, %v414_v50 }
 0x20a   :  { %v832_v54 = vpop.eup %831  ;;  %v489_v56 = vadd.f32 1.0, %v830_v51 }
 0x20b   :  { %v609_v57 = vsel %vm608_vm14, %v828_v40, %v605_v52  ;;  %v617_v58 = vmul.f32 %v832_v54, %v488_v42  ;;  %833 = vpow2.f32 %v782_v53  ;;  %vm622_vm0 = vweird.f32 %v832_v54 }
 0x20c   :  { %v614_v59 = vsel %vm611_vm15, %v613_v55, %v609_v57  ;;  %835 = vrcp.f32 %v489_v56  ;;  %vm623_vm2 = vmor %vm621_vm1, %vm622_vm0  ;;  %v642_v11 = vand.u32 2147483648, %v489_v56  ;;  %v640_v13 = vand.u32 2147483647, %v489_v56 }
 0x20d   :  { %743 = vst [vmem:[#allocation7 + $0x38] sm:$0xff] %v614_v59  ;;  %v618_v60 = vsub.f32 1.0, %v617_v58  ;;  %vm636_vm5 = vweird.f32 %v489_v56 }
 0x20e   :  { %v643_v19 = vor.u32 1.1754944e-38, %v642_v11  ;;  %vm641_vm7 = vcmp.eq.f32.partialorder %v640_v13, 8.507059e+37 }
 0x20f   :  { %v619_v62 = vmul.f32 %v832_v54, %v618_v60 }
 0x210   :  { %v417_v0 = vpop.f32.mrf.mxu3 }
 0x211   :  { %v834_v1 = vpop.eup %833  ;;  %v620_v2 = vadd.f32 %v832_v54, %v619_v62  ;;  %v783_v3 = vmul.f32 -1.442695, %v417_v0 }
 0x212   :  { %v836_v4 = vpop.eup %835  ;;  %v490_v6 = vadd.f32 1.0, %v834_v1 }
 0x213   :  { %v624_v7 = vsel %vm623_vm2, %v832_v54, %v620_v2  ;;  %v632_v8 = vmul.f32 %v836_v4, %v489_v56  ;;  %837 = vpow2.f32 %v783_v3  ;;  %vm637_vm4 = vweird.f32 %v836_v4 }
 0x214   :  { %v629_v9 = vsel %vm626_vm3, %v628_v5, %v624_v7  ;;  %839 = vrcp.f32 %v490_v6  ;;  %vm638_vm6 = vmor %vm636_vm5, %vm637_vm4  ;;  %v657_v25 = vand.u32 2147483648, %v490_v6  ;;  %v655_v27 = vand.u32 2147483647, %v490_v6 }
 0x215   :  { %744 = vst [vmem:[#allocation7 + $0x40] sm:$0xff] %v629_v9  ;;  %v633_v10 = vsub.f32 1.0, %v632_v8  ;;  %vm651_vm9 = vweird.f32 %v490_v6 }
 0x216   :  { %v658_v33 = vor.u32 1.1754944e-38, %v657_v25  ;;  %vm656_vm11 = vcmp.eq.f32.partialorder %v655_v27, 8.507059e+37 }
 0x217   :  { %v634_v12 = vmul.f32 %v836_v4, %v633_v10 }
 0x218   :  { %v420_v14 = vpop.f32.mrf.mxu3 }
 0x219   :  { %v838_v15 = vpop.eup %837  ;;  %v635_v16 = vadd.f32 %v836_v4, %v634_v12  ;;  %v784_v17 = vmul.f32 -1.442695, %v420_v14 }
 0x21a   :  { %v840_v18 = vpop.eup %839  ;;  %v491_v20 = vadd.f32 1.0, %v838_v15 }
 0x21b   :  { %v639_v21 = vsel %vm638_vm6, %v836_v4, %v635_v16  ;;  %v647_v22 = vmul.f32 %v840_v18, %v490_v6  ;;  %841 = vpow2.f32 %v784_v17  ;;  %vm652_vm8 = vweird.f32 %v840_v18 }
 0x21c   :  { %v644_v23 = vsel %vm641_vm7, %v643_v19, %v639_v21  ;;  %843 = vrcp.f32 %v491_v20  ;;  %vm653_vm10 = vmor %vm651_vm9, %vm652_vm8  ;;  %v672_v39 = vand.u32 2147483648, %v491_v20  ;;  %v670_v41 = vand.u32 2147483647, %v491_v20 }
 0x21d   :  { %745 = vst [vmem:[#allocation7 + $0x48] sm:$0xff] %v644_v23  ;;  %v648_v24 = vsub.f32 1.0, %v647_v22  ;;  %vm666_vm13 = vweird.f32 %v491_v20 }
 0x21e   :  { %v673_v47 = vor.u32 1.1754944e-38, %v672_v39  ;;  %vm671_vm15 = vcmp.eq.f32.partialorder %v670_v41, 8.507059e+37 }
 0x21f   :  { %v649_v26 = vmul.f32 %v840_v18, %v648_v24 }
 0x220   :  { %v423_v28 = vpop.f32.mrf.mxu3 }
 0x221   :  { %v842_v29 = vpop.eup %841  ;;  %v650_v30 = vadd.f32 %v840_v18, %v649_v26  ;;  %v785_v31 = vmul.f32 -1.442695, %v423_v28 }
 0x222   :  { %v844_v32 = vpop.eup %843  ;;  %v492_v34 = vadd.f32 1.0, %v842_v29 }
 0x223   :  { %v654_v35 = vsel %vm653_vm10, %v840_v18, %v650_v30  ;;  %v662_v36 = vmul.f32 %v844_v32, %v491_v20  ;;  %845 = vpow2.f32 %v785_v31  ;;  %vm667_vm12 = vweird.f32 %v844_v32 }
 0x224   :  { %v659_v37 = vsel %vm656_vm11, %v658_v33, %v654_v35  ;;  %847 = vrcp.f32 %v492_v34  ;;  %vm668_vm14 = vmor %vm666_vm13, %vm667_vm12  ;;  %v687_v53 = vand.u32 2147483648, %v492_v34  ;;  %v685_v55 = vand.u32 2147483647, %v492_v34 }
 0x225   :  { %746 = vst [vmem:[#allocation7 + $0x50] sm:$0xff] %v659_v37  ;;  %v663_v38 = vsub.f32 1.0, %v662_v36  ;;  %vm681_vm1 = vweird.f32 %v492_v34 }
 0x226   :  { %v688_v61 = vor.u32 1.1754944e-38, %v687_v53  ;;  %vm686_vm3 = vcmp.eq.f32.partialorder %v685_v55, 8.507059e+37 }
 0x227   :  { %v664_v40 = vmul.f32 %v844_v32, %v663_v38 }
 0x228   :  { %v426_v42 = vpop.f32.mrf.mxu3 }
 0x229   :  { %v846_v43 = vpop.eup %845  ;;  %v665_v44 = vadd.f32 %v844_v32, %v664_v40  ;;  %v786_v45 = vmul.f32 -1.442695, %v426_v42 }
 0x22a   :  { %v848_v46 = vpop.eup %847  ;;  %v493_v48 = vadd.f32 1.0, %v846_v43 }
 0x22b   :  { %v669_v49 = vsel %vm668_vm14, %v844_v32, %v665_v44  ;;  %v677_v50 = vmul.f32 %v848_v46, %v492_v34  ;;  %849 = vpow2.f32 %v786_v45  ;;  %vm682_vm0 = vweird.f32 %v848_v46 }
 0x22c   :  { %v674_v51 = vsel %vm671_vm15, %v673_v47, %v669_v49  ;;  %851 = vrcp.f32 %v493_v48  ;;  %vm683_vm2 = vmor %vm681_vm1, %vm682_vm0  ;;  %v702_v3 = vand.u32 2147483648, %v493_v48  ;;  %v700_v5 = vand.u32 2147483647, %v493_v48 }
 0x22d   :  { %747 = vst [vmem:[#allocation7 + $0x58] sm:$0xff] %v674_v51  ;;  %v678_v52 = vsub.f32 1.0, %v677_v50  ;;  %vm696_vm5 = vweird.f32 %v493_v48 }
 0x22e   :  { %v703_v9 = vor.u32 1.1754944e-38, %v702_v3  ;;  %vm701_vm7 = vcmp.eq.f32.partialorder %v700_v5, 8.507059e+37 }
 0x22f   :  { %v679_v54 = vmul.f32 %v848_v46, %v678_v52 }
 0x230   :  { %v429_v56 = vpop.f32.mrf.mxu3 }
 0x231   :  { %v850_v57 = vpop.eup %849  ;;  %v680_v58 = vadd.f32 %v848_v46, %v679_v54  ;;  %v787_v59 = vmul.f32 -1.442695, %v429_v56 }
 0x232   :  { %v852_v60 = vpop.eup %851  ;;  %v494_v62 = vadd.f32 1.0, %v850_v57 }
 0x233   :  { %v684_v63 = vsel %vm683_vm2, %v848_v46, %v680_v58  ;;  %v692_v0 = vmul.f32 %v852_v60, %v493_v48  ;;  %853 = vpow2.f32 %v787_v59  ;;  %vm697_vm4 = vweird.f32 %v852_v60 }
 0x234   :  { %v689_v1 = vsel %vm686_vm3, %v688_v61, %v684_v63  ;;  %855 = vrcp.f32 %v494_v62  ;;  %vm698_vm6 = vmor %vm696_vm5, %vm697_vm4  ;;  %v717_v15 = vand.u32 2147483648, %v494_v62  ;;  %v715_v17 = vand.u32 2147483647, %v494_v62 }
 0x235   :  { %748 = vst [vmem:[#allocation7 + $0x60] sm:$0xff] %v689_v1  ;;  %v693_v2 = vsub.f32 1.0, %v692_v0  ;;  %vm711_vm9 = vweird.f32 %v494_v62 }
 0x236   :  { %v718_v20 = vor.u32 1.1754944e-38, %v717_v15  ;;  %vm716_vm11 = vcmp.eq.f32.partialorder %v715_v17, 8.507059e+37 }
 0x237   :  { %v694_v4 = vmul.f32 %v852_v60, %v693_v2 }
 0x239   :  { %v854_v6 = vpop.eup %853  ;;  %v695_v7 = vadd.f32 %v852_v60, %v694_v4 }
 0x23a   :  { %v856_v8 = vpop.eup %855  ;;  %v495_v10 = vadd.f32 1.0, %v854_v6 }
 0x23b   :  { %v699_v11 = vsel %vm698_vm6, %v852_v60, %v695_v7  ;;  %v707_v12 = vmul.f32 %v856_v8, %v494_v62  ;;  %vm712_vm8 = vweird.f32 %v856_v8 }
 0x23c   :  { %v704_v13 = vsel %vm701_vm7, %v703_v9, %v699_v11  ;;  %857 = vrcp.f32 %v495_v10  ;;  %vm713_vm10 = vmor %vm711_vm9, %vm712_vm8  ;;  %v732_v25 = vand.u32 2147483648, %v495_v10  ;;  %v730_v27 = vand.u32 2147483647, %v495_v10 }
 0x23d   :  { %749 = vst [vmem:[#allocation7 + $0x68] sm:$0xff] %v704_v13  ;;  %v708_v14 = vsub.f32 1.0, %v707_v12  ;;  %vm726_vm13 = vweird.f32 %v495_v10 }
 0x23e   :  { %v733_v29 = vor.u32 1.1754944e-38, %v732_v25  ;;  %vm731_vm15 = vcmp.eq.f32.partialorder %v730_v27, 8.507059e+37 }
 0x23f   :  { %v709_v16 = vmul.f32 %v856_v8, %v708_v14 }
 0x241   :  { %v710_v18 = vadd.f32 %v856_v8, %v709_v16 }
 0x242   :  { %v858_v19 = vpop.eup %857 }
 0x243   :  { %v714_v21 = vsel %vm713_vm10, %v856_v8, %v710_v18  ;;  %v722_v22 = vmul.f32 %v858_v19, %v495_v10  ;;  %vm727_vm12 = vweird.f32 %v858_v19 }
 0x244   :  { %v719_v23 = vsel %vm716_vm11, %v718_v20, %v714_v21  ;;  %vm728_vm14 = vmor %vm726_vm13, %vm727_vm12 }
 0x245   :  { %750 = vst [vmem:[#allocation7 + $0x70] sm:$0xff] %v719_v23  ;;  %v723_v24 = vsub.f32 1.0, %v722_v22 }
 0x247   :  { %v724_v26 = vmul.f32 %v858_v19, %v723_v24 }
 0x249   :  { %v725_v28 = vadd.f32 %v858_v19, %v724_v26 }
 0x24b   :  { %v729_v30 = vsel %vm728_vm14, %v858_v19, %v725_v28 }
 0x24c   :  { %v734_v31 = vsel %vm731_vm15, %v733_v29, %v729_v30 }
 0x24d   :  { %751 = vst [vmem:[#allocation7 + $0x78] sm:$0xff] %v734_v31 }
 0x24e   :  { %764 = dma.vmem_to_hbm [thread:$0]  %s757_s1, 2048, %s759_s25, [#allocation4], %s941_s21, %s941_s21, %s942_s22  }
 0x24f   :  { %935 = dma.done.wait [#allocation4], 2048  }
 0x250   :  { %936 = vsyncadd [#allocation4], 4294965248 }
 0x251   :  { %769 = vsyncpa [#allocation3], 1 }
 0x252   :  { %770 = vsyncpa [#allocation6], 1 }
 0x253   :  { %771 = vsyncpa [#allocation4], 1 }

</bundles_post_ra>
